<compile_context>
chip_gen: v7x
topology: tpu7x:2x2x1
jax: 0.10.0
libtpu: 0.0.40
codegen_flags: <defaults>
</compile_context>

<pallas_src>
import functools

import jax
import jax.numpy as jnp
from jax.experimental import pallas as pl
from jax.experimental.pallas import tpu as pltpu


def _round_up(x: int, m: int) -> int:
    return ((x + m - 1) // m) * m


_SQRT_HALF = 0.7071067811865476


def _erf_approx(z):
    # Abramowitz & Stegun 7.1.26 rational approximation, |err| <= 1.5e-7.
    # (Only exp / mul / add / where -> guaranteed Mosaic lowering.)
    p = 0.3275911
    a1, a2, a3, a4, a5 = (0.254829592, -0.284496736, 1.421413741,
                          -1.453152027, 1.061405429)
    az = jnp.abs(z)
    t = 1.0 / (1.0 + p * az)
    poly = ((((a5 * t + a4) * t + a3) * t + a2) * t + a1) * t
    y = 1.0 - poly * jnp.exp(-az * az)
    return jnp.where(z < 0, -y, y)


def _gelu_exact(x):
    # torch.nn.GELU() default (exact, erf-based) gelu.
    return 0.5 * x * (1.0 + _erf_approx(x * _SQRT_HALF))


def _eca_two_kernel(x_ref, w_ref, o_ref, *, k_size: int, width: int,
                    l_out: int, bt: int):
    # x_ref: (bt, C_pad, HW_long) ; w_ref: (KK_pad, C_pad) ; o_ref: (bt, 1, L_out)
    wmat = w_ref[...].astype(jnp.float32)                     # (KK_pad, C_pad)
    for t in range(bt):                                       # static, small
        x_img = x_ref[t].astype(jnp.float32)                  # (C_pad, HW_long)
        # Channel contraction for all k*k taps in one MXU matmul.
        z = jnp.dot(wmat, x_img, preferred_element_type=jnp.float32)
        # Accumulate the k*k statically shifted tap rows (flattened 2D conv).
        acc = z[0:1, 0:l_out]                                 # tap (0,0), shift 0
        for tap in range(1, k_size * k_size):
            p, q = divmod(tap, k_size)
            shift = p * width + q
            acc = acc + z[tap:tap + 1, shift:shift + l_out]
        o_ref[t] = _gelu_exact(acc).astype(o_ref.dtype)


def eca_layer_two_forward(x, conv_weight, k_size: int):
    """x: (B, C, H, W); conv_weight: PyTorch Conv2d weight (1, C, k, k)."""
    b, c, h, w = x.shape
    assert conv_weight.shape == (1, c, k_size, k_size)
    assert k_size <= h and k_size <= w
    h_out = h - k_size + 1
    w_out = w - k_size + 1
    hw = h * w
    kk = k_size * k_size

    # Lane-dense padded sizes.
    max_shift = (k_size - 1) * w + (k_size - 1)
    l_out = _round_up(hw, 128)                          # output row width
    hw_long = l_out + (_round_up(max_shift, 128) if max_shift > 0 else 0)
    c_pad = _round_up(c, 8)
    kk_pad = _round_up(kk, 8)

    # Batch blocking: amortize per-grid-step overhead, stay inside VMEM budget.
    bytes_per_image = c_pad * hw_long * jnp.dtype(x.dtype).itemsize
    vmem_budget = 4 * 1024 * 1024                       # per-block input budget
    bt = max(1, min(b, 8, vmem_budget // max(bytes_per_image, 1)))
    b_pad = _round_up(b, bt)

    # Padded, flattened input (B_pad, C_pad, HW_long).
    x_flat = x.reshape(b, c, hw)
    x_flat = jnp.pad(x_flat, ((0, b_pad - b), (0, c_pad - c), (0, hw_long - hw)))

    # Weight (1, C, k, k) -> (KK_pad, C_pad), row p*k+q holds w[0, :, p, q].
    w_mat = conv_weight[0].reshape(c, kk).T.astype(jnp.float32)
    w_mat = jnp.pad(w_mat, ((0, kk_pad - kk), (0, c_pad - c)))

    grid = (b_pad // bt,)
    kernel = functools.partial(_eca_two_kernel, k_size=k_size, width=w,
                               l_out=l_out, bt=bt)

    itemsize = jnp.dtype(x.dtype).itemsize
    cost = pl.CostEstimate(
        flops=2 * b_pad * c_pad * hw_long * kk + b_pad * kk * l_out,
        transcendentals=b_pad * l_out,
        bytes_accessed=(b_pad * c_pad * hw_long * itemsize
                        + b_pad * l_out * itemsize
                        + kk_pad * c_pad * 4),
    )

    out = pl.pallas_call(
        kernel,
        out_shape=jax.ShapeDtypeStruct((b_pad, 1, l_out), x.dtype),
        grid=grid,
        in_specs=[
            pl.BlockSpec((bt, c_pad, hw_long), lambda i: (i, 0, 0)),
            pl.BlockSpec((kk_pad, c_pad), lambda i: (0, 0)),
        ],
        out_specs=pl.BlockSpec((bt, 1, l_out), lambda i: (i, 0, 0)),
        compiler_params=pltpu.CompilerParams(
            dimension_semantics=("parallel",),
            vmem_limit_bytes=32 * 1024 * 1024,
        ),
        cost_estimate=cost,
    )(x_flat, w_mat)

    # Crop padding, restore NCHW, crop to the valid conv output window.
    out = out[:b, :, :hw].reshape(b, 1, h, w)
    return out[:, :, :h_out, :w_out]


def eca_layer_two_ref(x, conv_weight):
    """Pure-JAX reference matching the PyTorch forward (Conv2d valid + exact GELU)."""
    y = jax.lax.conv_general_dilated(
        x, conv_weight, window_strides=(1, 1), padding="VALID",
        dimension_numbers=("NCHW", "OIHW", "NCHW"))
    return jax.nn.gelu(y, approximate=False)


if __name__ == "__main__":
    B, C, H, W = 2, 4, 16, 16
    K = 3

    key = jax.random.PRNGKey(0)
    kx, kw = jax.random.split(key)
    x = jax.random.normal(kx, (B, C, H, W), dtype=jnp.float32)

    # Deterministic init of Conv2d(C, 1, K, bias=False) weight: (1, C, K, K).
    fan_in = C * K * K
    bound = 1.0 / (fan_in ** 0.5)
    conv_weight = jax.random.uniform(kw, (1, C, K, K), jnp.float32, -bound, bound)

    out = eca_layer_two_forward(x, conv_weight, K)
    out = jax.block_until_ready(out)

    ref = eca_layer_two_ref(x, conv_weight)
    assert out.shape == (B, 1, H - K + 1, W - K + 1), out.shape
    max_err = float(jnp.max(jnp.abs(out - ref)))
    assert jnp.allclose(out, ref, atol=1e-5, rtol=1e-5), max_err

    print("KERNEL_OK")
</pallas_src>

<mosaic_0001>
module attributes {stable_mosaic.version = 11 : i64} {
  func.func @_eca_two_kernel(%arg0: i32, %arg1: memref<2x8x384xf32, #tpu.memory_space<vmem>>, %arg2: memref<16x8xf32, #tpu.memory_space<vmem>>, %arg3: memref<2x1x256xf32, #tpu.memory_space<vmem>>) attributes {dimension_semantics = [#tpu.dimension_semantics<parallel>], iteration_bounds = array<i64: 1>, scalar_prefetch = 0 : i64, scratch_operands = 0 : i64, tpu.core_type = #tpu.core_type<tc>, window_params = [{transform_indices = @transform_0, window_bounds = array<i64: 2, 8, 384>}, {pipeline_mode = #tpu.pipeline_mode<synchronous>, transform_indices = @transform_1, window_bounds = array<i64: 16, 8>}, {transform_indices = @transform_2, window_bounds = array<i64: 2, 1, 256>}]} {
    %c0 = arith.constant 0 : index
    %c0_0 = arith.constant 0 : index
    %0 = vector.load %arg2[%c0, %c0_0] : memref<16x8xf32, #tpu.memory_space<vmem>>, vector<16x8xf32>
    %c0_1 = arith.constant 0 : index
    %c0_2 = arith.constant 0 : index
    %c0_3 = arith.constant 0 : index
    %1 = vector.load %arg1[%c0_1, %c0_2, %c0_3] : memref<2x8x384xf32, #tpu.memory_space<vmem>>, vector<1x8x384xf32>
    %2 = vector.shape_cast %1 : vector<1x8x384xf32> to vector<8x384xf32>
    %cst = arith.constant dense<0.000000e+00> : vector<16x384xf32>
    %3 = tpu.matmul %0, %2, %cst {dimension_numbers = #tpu.dot_dimension_numbers<[1], [0], [0], [1], [0, 0, 1, 1], [], []>} : vector<16x8xf32>, vector<8x384xf32>, vector<16x384xf32> -> vector<16x384xf32>
    %4 = vector.extract_strided_slice %3 {offsets = [0, 0], sizes = [1, 256], strides = [1, 1]} : vector<16x384xf32> to vector<1x256xf32>
    %5 = vector.extract_strided_slice %3 {offsets = [1, 1], sizes = [1, 256], strides = [1, 1]} : vector<16x384xf32> to vector<1x256xf32>
    %6 = arith.addf %4, %5 : vector<1x256xf32>
    %7 = vector.extract_strided_slice %3 {offsets = [2, 2], sizes = [1, 256], strides = [1, 1]} : vector<16x384xf32> to vector<1x256xf32>
    %8 = arith.addf %6, %7 : vector<1x256xf32>
    %9 = vector.extract_strided_slice %3 {offsets = [3, 16], sizes = [1, 256], strides = [1, 1]} : vector<16x384xf32> to vector<1x256xf32>
    %10 = arith.addf %8, %9 : vector<1x256xf32>
    %11 = vector.extract_strided_slice %3 {offsets = [4, 17], sizes = [1, 256], strides = [1, 1]} : vector<16x384xf32> to vector<1x256xf32>
    %12 = arith.addf %10, %11 : vector<1x256xf32>
    %13 = vector.extract_strided_slice %3 {offsets = [5, 18], sizes = [1, 256], strides = [1, 1]} : vector<16x384xf32> to vector<1x256xf32>
    %14 = arith.addf %12, %13 : vector<1x256xf32>
    %15 = vector.extract_strided_slice %3 {offsets = [6, 32], sizes = [1, 256], strides = [1, 1]} : vector<16x384xf32> to vector<1x256xf32>
    %16 = arith.addf %14, %15 : vector<1x256xf32>
    %17 = vector.extract_strided_slice %3 {offsets = [7, 33], sizes = [1, 256], strides = [1, 1]} : vector<16x384xf32> to vector<1x256xf32>
    %18 = arith.addf %16, %17 : vector<1x256xf32>
    %19 = vector.extract_strided_slice %3 {offsets = [8, 34], sizes = [1, 256], strides = [1, 1]} : vector<16x384xf32> to vector<1x256xf32>
    %20 = arith.addf %18, %19 : vector<1x256xf32>
    %cst_4 = arith.constant 5.000000e-01 : f32
    %21 = vector.broadcast %cst_4 : f32 to vector<1x256xf32>
    %22 = arith.mulf %21, %20 : vector<1x256xf32>
    %cst_5 = arith.constant 0.707106769 : f32
    %23 = vector.broadcast %cst_5 : f32 to vector<1x256xf32>
    %24 = arith.mulf %20, %23 : vector<1x256xf32>
    %25 = math.absf %24 : vector<1x256xf32>
    %cst_6 = arith.constant 0.327591091 : f32
    %26 = vector.broadcast %cst_6 : f32 to vector<1x256xf32>
    %27 = arith.mulf %26, %25 : vector<1x256xf32>
    %cst_7 = arith.constant 1.000000e+00 : f32
    %28 = vector.broadcast %cst_7 : f32 to vector<1x256xf32>
    %29 = arith.addf %28, %27 : vector<1x256xf32>
    %cst_8 = arith.constant 1.000000e+00 : f32
    %30 = vector.broadcast %cst_8 : f32 to vector<1x256xf32>
    %31 = arith.divf %30, %29 : vector<1x256xf32>
    %cst_9 = arith.constant 1.06140542 : f32
    %32 = vector.broadcast %cst_9 : f32 to vector<1x256xf32>
    %33 = arith.mulf %32, %31 : vector<1x256xf32>
    %cst_10 = arith.constant -1.45315206 : f32
    %34 = vector.broadcast %cst_10 : f32 to vector<1x256xf32>
    %35 = arith.addf %33, %34 : vector<1x256xf32>
    %36 = arith.mulf %35, %31 : vector<1x256xf32>
    %cst_11 = arith.constant 1.42141378 : f32
    %37 = vector.broadcast %cst_11 : f32 to vector<1x256xf32>
    %38 = arith.addf %36, %37 : vector<1x256xf32>
    %39 = arith.mulf %38, %31 : vector<1x256xf32>
    %cst_12 = arith.constant -0.284496725 : f32
    %40 = vector.broadcast %cst_12 : f32 to vector<1x256xf32>
    %41 = arith.addf %39, %40 : vector<1x256xf32>
    %42 = arith.mulf %41, %31 : vector<1x256xf32>
    %cst_13 = arith.constant 0.254829586 : f32
    %43 = vector.broadcast %cst_13 : f32 to vector<1x256xf32>
    %44 = arith.addf %42, %43 : vector<1x256xf32>
    %45 = arith.mulf %44, %31 : vector<1x256xf32>
    %cst_14 = arith.constant 0.000000e+00 : f32
    %46 = vector.broadcast %cst_14 : f32 to vector<1x256xf32>
    %47 = arith.subf %46, %25 : vector<1x256xf32>
    %48 = arith.mulf %47, %25 : vector<1x256xf32>
    %49 = math.exp %48 : vector<1x256xf32>
    %50 = arith.mulf %45, %49 : vector<1x256xf32>
    %cst_15 = arith.constant 1.000000e+00 : f32
    %51 = vector.broadcast %cst_15 : f32 to vector<1x256xf32>
    %52 = arith.subf %51, %50 : vector<1x256xf32>
    %cst_16 = arith.constant 0.000000e+00 : f32
    %53 = vector.broadcast %cst_16 : f32 to vector<1x256xf32>
    %54 = arith.cmpf olt, %24, %53 : vector<1x256xf32>
    %cst_17 = arith.constant 0.000000e+00 : f32
    %55 = vector.broadcast %cst_17 : f32 to vector<1x256xf32>
    %56 = arith.subf %55, %52 : vector<1x256xf32>
    %57 = arith.select %54, %56, %52 : vector<1x256xi1>, vector<1x256xf32>
    %cst_18 = arith.constant 1.000000e+00 : f32
    %58 = vector.broadcast %cst_18 : f32 to vector<1x256xf32>
    %59 = arith.addf %58, %57 : vector<1x256xf32>
    %60 = arith.mulf %22, %59 : vector<1x256xf32>
    %c0_19 = arith.constant 0 : index
    %c0_20 = arith.constant 0 : index
    %c0_21 = arith.constant 0 : index
    %61 = vector.load %arg3[%c0_19, %c0_20, %c0_21] : memref<2x1x256xf32, #tpu.memory_space<vmem>>, vector<1x1x256xf32>
    %62 = vector.shape_cast %61 : vector<1x1x256xf32> to vector<1x256xf32>
    %63 = vector.shape_cast %60 : vector<1x256xf32> to vector<1x1x256xf32>
    tpu.vector_store %arg3[%c0_19, %c0_20, %c0_21], %63 {strides = array<i32>} : memref<2x1x256xf32, #tpu.memory_space<vmem>>, vector<1x1x256xf32>,
    %c1 = arith.constant 1 : index
    %c0_22 = arith.constant 0 : index
    %c0_23 = arith.constant 0 : index
    %64 = vector.load %arg1[%c1, %c0_22, %c0_23] : memref<2x8x384xf32, #tpu.memory_space<vmem>>, vector<1x8x384xf32>
    %65 = vector.shape_cast %64 : vector<1x8x384xf32> to vector<8x384xf32>
    %cst_24 = arith.constant dense<0.000000e+00> : vector<16x384xf32>
    %66 = tpu.matmul %0, %65, %cst_24 {dimension_numbers = #tpu.dot_dimension_numbers<[1], [0], [0], [1], [0, 0, 1, 1], [], []>} : vector<16x8xf32>, vector<8x384xf32>, vector<16x384xf32> -> vector<16x384xf32>
    %67 = vector.extract_strided_slice %66 {offsets = [0, 0], sizes = [1, 256], strides = [1, 1]} : vector<16x384xf32> to vector<1x256xf32>
    %68 = vector.extract_strided_slice %66 {offsets = [1, 1], sizes = [1, 256], strides = [1, 1]} : vector<16x384xf32> to vector<1x256xf32>
    %69 = arith.addf %67, %68 : vector<1x256xf32>
    %70 = vector.extract_strided_slice %66 {offsets = [2, 2], sizes = [1, 256], strides = [1, 1]} : vector<16x384xf32> to vector<1x256xf32>
    %71 = arith.addf %69, %70 : vector<1x256xf32>
    %72 = vector.extract_strided_slice %66 {offsets = [3, 16], sizes = [1, 256], strides = [1, 1]} : vector<16x384xf32> to vector<1x256xf32>
    %73 = arith.addf %71, %72 : vector<1x256xf32>
    %74 = vector.extract_strided_slice %66 {offsets = [4, 17], sizes = [1, 256], strides = [1, 1]} : vector<16x384xf32> to vector<1x256xf32>
    %75 = arith.addf %73, %74 : vector<1x256xf32>
    %76 = vector.extract_strided_slice %66 {offsets = [5, 18], sizes = [1, 256], strides = [1, 1]} : vector<16x384xf32> to vector<1x256xf32>
    %77 = arith.addf %75, %76 : vector<1x256xf32>
    %78 = vector.extract_strided_slice %66 {offsets = [6, 32], sizes = [1, 256], strides = [1, 1]} : vector<16x384xf32> to vector<1x256xf32>
    %79 = arith.addf %77, %78 : vector<1x256xf32>
    %80 = vector.extract_strided_slice %66 {offsets = [7, 33], sizes = [1, 256], strides = [1, 1]} : vector<16x384xf32> to vector<1x256xf32>
    %81 = arith.addf %79, %80 : vector<1x256xf32>
    %82 = vector.extract_strided_slice %66 {offsets = [8, 34], sizes = [1, 256], strides = [1, 1]} : vector<16x384xf32> to vector<1x256xf32>
    %83 = arith.addf %81, %82 : vector<1x256xf32>
    %cst_25 = arith.constant 5.000000e-01 : f32
    %84 = vector.broadcast %cst_25 : f32 to vector<1x256xf32>
    %85 = arith.mulf %84, %83 : vector<1x256xf32>
    %cst_26 = arith.constant 0.707106769 : f32
    %86 = vector.broadcast %cst_26 : f32 to vector<1x256xf32>
    %87 = arith.mulf %83, %86 : vector<1x256xf32>
    %88 = math.absf %87 : vector<1x256xf32>
    %cst_27 = arith.constant 0.327591091 : f32
    %89 = vector.broadcast %cst_27 : f32 to vector<1x256xf32>
    %90 = arith.mulf %89, %88 : vector<1x256xf32>
    %cst_28 = arith.constant 1.000000e+00 : f32
    %91 = vector.broadcast %cst_28 : f32 to vector<1x256xf32>
    %92 = arith.addf %91, %90 : vector<1x256xf32>
    %cst_29 = arith.constant 1.000000e+00 : f32
    %93 = vector.broadcast %cst_29 : f32 to vector<1x256xf32>
    %94 = arith.divf %93, %92 : vector<1x256xf32>
    %cst_30 = arith.constant 1.06140542 : f32
    %95 = vector.broadcast %cst_30 : f32 to vector<1x256xf32>
    %96 = arith.mulf %95, %94 : vector<1x256xf32>
    %cst_31 = arith.constant -1.45315206 : f32
    %97 = vector.broadcast %cst_31 : f32 to vector<1x256xf32>
    %98 = arith.addf %96, %97 : vector<1x256xf32>
    %99 = arith.mulf %98, %94 : vector<1x256xf32>
    %cst_32 = arith.constant 1.42141378 : f32
    %100 = vector.broadcast %cst_32 : f32 to vector<1x256xf32>
    %101 = arith.addf %99, %100 : vector<1x256xf32>
    %102 = arith.mulf %101, %94 : vector<1x256xf32>
    %cst_33 = arith.constant -0.284496725 : f32
    %103 = vector.broadcast %cst_33 : f32 to vector<1x256xf32>
    %104 = arith.addf %102, %103 : vector<1x256xf32>
    %105 = arith.mulf %104, %94 : vector<1x256xf32>
    %cst_34 = arith.constant 0.254829586 : f32
    %106 = vector.broadcast %cst_34 : f32 to vector<1x256xf32>
    %107 = arith.addf %105, %106 : vector<1x256xf32>
    %108 = arith.mulf %107, %94 : vector<1x256xf32>
    %cst_35 = arith.constant 0.000000e+00 : f32
    %109 = vector.broadcast %cst_35 : f32 to vector<1x256xf32>
    %110 = arith.subf %109, %88 : vector<1x256xf32>
    %111 = arith.mulf %110, %88 : vector<1x256xf32>
    %112 = math.exp %111 : vector<1x256xf32>
    %113 = arith.mulf %108, %112 : vector<1x256xf32>
    %cst_36 = arith.constant 1.000000e+00 : f32
    %114 = vector.broadcast %cst_36 : f32 to vector<1x256xf32>
    %115 = arith.subf %114, %113 : vector<1x256xf32>
    %cst_37 = arith.constant 0.000000e+00 : f32
    %116 = vector.broadcast %cst_37 : f32 to vector<1x256xf32>
    %117 = arith.cmpf olt, %87, %116 : vector<1x256xf32>
    %cst_38 = arith.constant 0.000000e+00 : f32
    %118 = vector.broadcast %cst_38 : f32 to vector<1x256xf32>
    %119 = arith.subf %118, %115 : vector<1x256xf32>
    %120 = arith.select %117, %119, %115 : vector<1x256xi1>, vector<1x256xf32>
    %cst_39 = arith.constant 1.000000e+00 : f32
    %121 = vector.broadcast %cst_39 : f32 to vector<1x256xf32>
    %122 = arith.addf %121, %120 : vector<1x256xf32>
    %123 = arith.mulf %85, %122 : vector<1x256xf32>
    %c1_40 = arith.constant 1 : index
    %c0_41 = arith.constant 0 : index
    %c0_42 = arith.constant 0 : index
    %124 = vector.load %arg3[%c1_40, %c0_41, %c0_42] : memref<2x1x256xf32, #tpu.memory_space<vmem>>, vector<1x1x256xf32>
    %125 = vector.shape_cast %124 : vector<1x1x256xf32> to vector<1x256xf32>
    %126 = vector.shape_cast %123 : vector<1x256xf32> to vector<1x1x256xf32>
    tpu.vector_store %arg3[%c1_40, %c0_41, %c0_42], %126 {strides = array<i32>} : memref<2x1x256xf32, #tpu.memory_space<vmem>>, vector<1x1x256xf32>,
    return
  }
  func.func @transform_0(%arg0: i32) -> (i32, i32, i32) {
    %c0_i32 = arith.constant 0 : i32
    %c0_i32_0 = arith.constant 0 : i32
    %c0_i32_1 = arith.constant 0 : i32
    return %arg0, %c0_i32, %c0_i32_0 : i32, i32, i32
  }
  func.func @transform_1(%arg0: i32) -> (i32, i32) {
    %c0_i32 = arith.constant 0 : i32
    %c0_i32_0 = arith.constant 0 : i32
    %c0_i32_1 = arith.constant 0 : i32
    return %c0_i32, %c0_i32_0 : i32, i32
  }
  func.func @transform_2(%arg0: i32) -> (i32, i32, i32) {
    %c0_i32 = arith.constant 0 : i32
    %c0_i32_0 = arith.constant 0 : i32
    %c0_i32_1 = arith.constant 0 : i32
    return %arg0, %c0_i32, %c0_i32_0 : i32, i32, i32
  }
}

</mosaic_0001>

<bundles_post_ra>
// kernel: tpu_custom_call.1
= control target key start
LH: loop header
LB: loop body
LE: loop exit
PB: predicated region body
PF: predicated region fallthrough
CT: control target
= control target key end

     0   :  { %7 = vsyncpa [#allocation3], 0  ;;  %s1155_s0 = inlined_call_operand.hbm [shape: f32[2,8,384], index: 0, kind: input, shape index: {}]   ;;  %s1156_s1 = inlined_call_operand.vmem [shape: f32[16,8], index: 1, kind: input, shape index: {}]   ;;  %s1157_s2 = inlined_call_operand.hbm [shape: f32[2,1,256], index: 2, kind: output, shape index: {}]  }
   0x1   :  { %8 = vsyncpa [#allocation4], 0  ;;  %s872_s9 = smov [#allocation2]   ;;  %s824_s13 = scalar_lea.hbm %s1155_s0, 768 }
   0x2   :  { %s14_s10 = sshll.u32 %s872_s9, 4  ;;  %p825_p0 = scmp.ne.s32.totalorder %s1155_s0, %s824_s13  ;;  %s15_s10 = int_to_ptr.vmem [resolvable:$true] %s14_s10 }
   0x3   :  { %p828_p1 = scmp.lt.u32.totalorder %s824_s13, %s1155_s0 }
   0x5   :  { %p830_p2 = pnand %p828_p1, %p825_p0 }
   0x7   :  { %833 = shalt.err (!%p830_p2)
}
   0x8   :  { %s834_s18 = scalar_lea.vmem %s15_s10, 768  ;;  %p839_p4 = scmp.lt.s32.totalorder %s15_s10, %s15_s10 }
   0x9   :  { %p835_p3 = scmp.ne.s32.totalorder %s15_s10, %s834_s18  ;;  %p840_p5 = scmp.lt.s32.totalorder %s834_s18, %s834_s18 }
   0xb   :  { %p841_p6 = por %p840_p5, %p839_p4 }
   0xd   :  { %p842_p7 = pnand %p841_p6, %p835_p3 }
   0xf   :  { %845 = shalt.err (!%p842_p7)
}
  0x10   :  { %s873_s19 = smov 384   ;;  %s874_s20 = smov 24  }
  0x11   :  { %20 = dma.hbm_to_vmem [thread:$0]  %s1155_s0, 768, %s15_s10, [#allocation3], %s873_s19, %s873_s19, %s874_s20  }
  0x12   :  { %868 = dma.done.wait [#allocation3], 768  }
  0x13   :  { %869 = vsyncadd [#allocation3], 4294966528  ;;  %v875_v0 = vmov 0.0   ;;  %vm31_vm0 = vcmask 64512   ;;  %v30_v1 = vld [vmem:[#allocation2 + $0x10] sm:$0xff]  ;;  %v26_v2 = vld [vmem:[%s1156_s1] sm:$0xff] }
  0x14   :  { %102 = vmatprep.mubr.f32.mxu0 %v875_v0  ;;  %v29_v3 = vld [vmem:[#allocation2 + $0x8] sm:$0xff]  ;;  %782 = vmatprep.subr.mxu1 %v30_v1  ;;  %v28_v5 = vld [vmem:[#allocation2] sm:$0xff]  ;;  %v399_v7 = vld [vmem:[#allocation2 + $0x18] sm:$0xff]  ;;  %s876_s0 = smov 94   ;;  %s878_s27 = smov 126   ;;  %vm202_vm1 = vcmask 1039360  }
  0x15   :  { %784 = vmatprep.mubr.msk.f32.mxu1 %vm31_vm0, %v26_v2  ;;  %v27_v4 = vld [vmem:[%s1156_s1 + $0x8] sm:$0xff]  ;;  %v400_v6 = vld [vmem:[#allocation2 + $0x20] sm:$0xff]  ;;  %783 = vmatpush3.msra.mxu1 %v30_v1  ;;  %s877_s1 = smov 127   ;;  %s879_s28 = smov 112   ;;  %vm218_vm2 = vcmask 1031168   ;;  %vm234_vm3 = vcmask 916480  }
  0x16   :  { %38 = vmatprep.subr.mxu0 %v29_v3  ;;  %785 = vmatmul.mubr.msk.f32.vlgmr.msra.gmra.mrb[0].mxu1 %vm31_vm0, %v27_v4  ;;  %v401_v8 = vld [vmem:[#allocation2 + $0x28] sm:$0xff]  ;;  %s880_s29 = smov 111   ;;  %s881_s30 = smov 110   ;;  %vm250_vm4 = vcmask 908288   ;;  %vm266_vm5 = vcmask 900096   ;;  %vm282_vm6 = vcmask 785408  }
  0x17   :  { %39 = vmatpush1.msra.mxu0 %v28_v5  ;;  %402 = vmatprep.subr.mxu1 %v400_v6  ;;  %s882_s3 = smov 96   ;;  %s883_s4 = smov 95   ;;  %vm298_vm7 = vcmask 777216   ;;  %vm314_vm8 = vcmask 769024  }
  0x18   :  { %768 = vmatmul.mubr.msk.f32.vlgmr.msra.gmra.mrb[0].mxu0 %vm31_vm0, %v26_v2  ;;  %403 = vmatpush1.msra.mxu1 %v399_v7  ;;  %s885_s5 = smov [#allocation5]  }
  0x19   :  { %108 = vmatprep.mubr.f32.mxu0 %v875_v0  ;;  %466 = vmatprep.mubr.f32.mxu1 %v875_v0  ;;  %s756_s6 = sshll.u32 %s885_s5, 4  ;;  %s757_s6 = int_to_ptr.vmem [resolvable:$true] %s756_s6 }
  0x1a   :  { %787 = vmatprep.subr.mxu0 %v401_v8  ;;  %772 = vmatmul.mubr.msk.f32.vlgmr.msra.gmra.mrb[2].mxu1 %vm31_vm0, %v26_v2  ;;  %s846_s7 = scalar_lea.vmem %s757_s6, 64  ;;  %p851_p9 = scmp.lt.s32.totalorder %s757_s6, %s757_s6 }
  0x1b   :  { %788 = vmatpush3.msra.mxu0 %v401_v8  ;;  %472 = vmatprep.mubr.f32.mxu1 %v875_v0  ;;  %p847_p8 = scmp.ne.s32.totalorder %s757_s6, %s846_s7  ;;  %p852_p10 = scmp.lt.s32.totalorder %s846_s7, %s846_s7 }
  0x1c   :  { %769 = vmatmul.mubr.msk.f32.gmra.mrb[2].mxu0 %vm31_vm0, %v27_v4 }
  0x1d   :  { %789 = vmatprep.mubr.msk.f32.mxu0 %vm31_vm0, %v26_v2  ;;  %p853_p11 = por %p852_p10, %p851_p9 }
  0x1e   :  { %773 = vmatmul.mubr.msk.f32.gmra.mrb[4].mxu1 %vm31_vm0, %v27_v4 }
  0x1f   :  { %p854_p12 = pnand %p853_p11, %p847_p8 }
  0x20   :  { %790 = vmatmul.mubr.msk.f32.vlgmr.msra.gmra.mrb[4].mxu0 %vm31_vm0, %v27_v4 }
  0xe9   :  { %v786_v9 = vpop.f32.mrb[0].mxu1 }
  0xea   :  { %312 = vrot.lane.b32.xlu0 %v786_v9, %s876_s0  ;;  %v930_v10 = vpop.f32.mrb[1].mxu1 }
  0xeb   :  { %v932_v11 = vpop.f32.mrb[0].mxu0  ;;  %v195_v12 = vrot.slane %v930_v10, 1  ;;  %v211_v37 = vrot.slane %v930_v10, 2  ;;  %v227_v39 = vrot.slane %v930_v10, 3  ;;  %v243_v41 = vrot.slane %v930_v10, 4 }
  0xec   :  { %v935_v13 = vpop.f32.mrb[1].mxu0  ;;  %v193_v14 = vrot.slane %v932_v11, 1  ;;  %v209_v20 = vrot.slane %v932_v11, 2  ;;  %v225_v26 = vrot.slane %v932_v11, 3  ;;  %v241_v28 = vrot.slane %v932_v11, 4 }
  0xed   :  { %200 = vrot.lane.b32.xlu1 %v195_v12, %s877_s1  ;;  %v210_v15 = vrot.slane %v935_v13, 2  ;;  %v940_v16 = vpop.f32.mrb[2].mxu1  ;;  %v226_v24 = vrot.slane %v935_v13, 3  ;;  %v242_v27 = vrot.slane %v935_v13, 4  ;;  %v258_v29 = vrot.slane %v935_v13, 5 }
  0xee   :  { %196 = vrot.lane.b32.xlu0 %v193_v14, %s877_s1  ;;  %v945_v18 = vpop.f32.mrb[3].mxu1  ;;  %v257_v30 = vrot.slane %v932_v11, 5  ;;  %v274_v31 = vrot.slane %v935_v13, 6  ;;  %v273_v32 = vrot.slane %v932_v11, 6  ;;  %v290_v33 = vrot.slane %v935_v13, 7 }
  0xef   :  { %v943_v17 = vpop.f32.mrb[2].mxu0  ;;  %v289_v34 = vrot.slane %v932_v11, 7  ;;  %v194_v35 = vrot.slane %v935_v13, 1  ;;  %v557_v36 = vrot.slane %v940_v16, 1  ;;  %v572_v38 = vrot.slane %v940_v16, 2 }
  0xf0   :  { %v112_v19 = vpop.f32.mrb[3].mxu0  ;;  %v587_v40 = vrot.slane %v940_v16, 3  ;;  %v602_v42 = vrot.slane %v940_v16, 4  ;;  %v259_v43 = vrot.slane %v930_v10, 5  ;;  %v617_v44 = vrot.slane %v940_v16, 5 }
  0xf1   :  { %214 = vrot.lane.b32.xlu1 %v210_v15, %s878_s27  ;;  %v474_v21 = vpop.f32.mrb[4].mxu1  ;;  %v275_v45 = vrot.slane %v930_v10, 6  ;;  %v632_v46 = vrot.slane %v940_v16, 6  ;;  %v291_v47 = vrot.slane %v930_v10, 7  ;;  %v647_v48 = vrot.slane %v940_v16, 7 }
  0xf2   :  { %212 = vrot.lane.b32.xlu0 %v209_v20, %s878_s27  ;;  %v950_v22 = vpop.f32.mrb[5].mxu1  ;;  %v558_v49 = vrot.slane %v945_v18, 1  ;;  %v573_v51 = vrot.slane %v945_v18, 2  ;;  %v588_v53 = vrot.slane %v945_v18, 3  ;;  %v603_v55 = vrot.slane %v945_v18, 4 }
  0xf3   :  { %v952_v23 = vpop.f32.mrb[4].mxu0  ;;  %v618_v57 = vrot.slane %v945_v18, 5  ;;  %v633_v59 = vrot.slane %v945_v18, 6  ;;  %v648_v61 = vrot.slane %v945_v18, 7 }
  0xf4   :  { %v955_v25 = vpop.f32.mrb[5].mxu0 }
  0xf5   :  { %230 = vrot.lane.b32.xlu1 %v226_v24, %s879_s28  ;;  %v559_v50 = vrot.slane %v955_v25, 1  ;;  %v574_v52 = vrot.slane %v955_v25, 2  ;;  %v589_v54 = vrot.slane %v955_v25, 3  ;;  %v604_v56 = vrot.slane %v955_v25, 4 }
  0xf6   :  { %228 = vrot.lane.b32.xlu0 %v225_v26, %s879_s28  ;;  %v619_v58 = vrot.slane %v955_v25, 5  ;;  %v634_v60 = vrot.slane %v955_v25, 6  ;;  %v649_v62 = vrot.slane %v955_v25, 7 }
  0xf9   :  { %246 = vrot.lane.b32.xlu1 %v242_v27, %s880_s29 }
  0xfa   :  { %244 = vrot.lane.b32.xlu0 %v241_v28, %s880_s29 }
  0xfd   :  { %262 = vrot.lane.b32.xlu1 %v258_v29, %s881_s30 }
  0xfe   :  { %260 = vrot.lane.b32.xlu0 %v257_v30, %s881_s30 }
 0x101   :  { %278 = vrot.lane.b32.xlu1 %v274_v31, %s882_s3 }
 0x102   :  { %276 = vrot.lane.b32.xlu0 %v273_v32, %s882_s3 }
 0x105   :  { %294 = vrot.lane.b32.xlu1 %v290_v33, %s883_s4 }
 0x106   :  { %292 = vrot.lane.b32.xlu0 %v289_v34, %s883_s4 }
 0x109   :  { %310 = vrot.lane.b32.xlu1 %v112_v19, %s876_s0 }
 0x10a   :  { %198 = vrot.lane.b32.xlu0 %v194_v35, %s877_s1 }
 0x10d   :  { %560 = vrot.lane.b32.xlu1 %v557_v36, %s877_s1 }
 0x10e   :  { %216 = vrot.lane.b32.xlu0 %v211_v37, %s878_s27 }
 0x111   :  { %575 = vrot.lane.b32.xlu1 %v572_v38, %s878_s27 }
 0x112   :  { %232 = vrot.lane.b32.xlu0 %v227_v39, %s879_s28 }
 0x115   :  { %590 = vrot.lane.b32.xlu1 %v587_v40, %s879_s28 }
 0x116   :  { %248 = vrot.lane.b32.xlu0 %v243_v41, %s880_s29 }
 0x119   :  { %605 = vrot.lane.b32.xlu1 %v602_v42, %s880_s29 }
 0x11a   :  { %264 = vrot.lane.b32.xlu0 %v259_v43, %s881_s30 }
 0x11d   :  { %620 = vrot.lane.b32.xlu1 %v617_v44, %s881_s30 }
 0x11e   :  { %280 = vrot.lane.b32.xlu0 %v275_v45, %s882_s3 }
 0x121   :  { %635 = vrot.lane.b32.xlu1 %v632_v46, %s882_s3 }
 0x122   :  { %296 = vrot.lane.b32.xlu0 %v291_v47, %s883_s4 }
 0x125   :  { %650 = vrot.lane.b32.xlu1 %v647_v48, %s883_s4 }
 0x126   :  { %308 = vrot.lane.b32.xlu0 %v943_v17, %s876_s0 }
 0x129   :  { %665 = vrot.lane.b32.xlu1 %v474_v21, %s876_s0 }
 0x12a   :  { %562 = vrot.lane.b32.xlu0 %v558_v49, %s877_s1 }
 0x12d   :  { %564 = vrot.lane.b32.xlu1 %v559_v50, %s877_s1 }
 0x12e   :  { %577 = vrot.lane.b32.xlu0 %v573_v51, %s878_s27 }
 0x131   :  { %579 = vrot.lane.b32.xlu1 %v574_v52, %s878_s27 }
 0x132   :  { %592 = vrot.lane.b32.xlu0 %v588_v53, %s879_s28 }
 0x135   :  { %594 = vrot.lane.b32.xlu1 %v589_v54, %s879_s28 }
 0x136   :  { %607 = vrot.lane.b32.xlu0 %v603_v55, %s880_s29 }
 0x139   :  { %609 = vrot.lane.b32.xlu1 %v604_v56, %s880_s29 }
 0x13a   :  { %622 = vrot.lane.b32.xlu0 %v618_v57, %s881_s30 }
 0x13d   :  { %624 = vrot.lane.b32.xlu1 %v619_v58, %s881_s30 }
 0x13e   :  { %637 = vrot.lane.b32.xlu0 %v633_v59, %s882_s3 }
 0x141   :  { %639 = vrot.lane.b32.xlu1 %v634_v60, %s882_s3 }
 0x142   :  { %652 = vrot.lane.b32.xlu0 %v648_v61, %s883_s4 }
 0x145   :  { %654 = vrot.lane.b32.xlu1 %v649_v62, %s883_s4 }
 0x146   :  { %667 = vrot.lane.b32.xlu0 %v950_v22, %s876_s0 }
 0x149   :  { %669 = vrot.lane.b32.xlu1 %v952_v23, %s876_s0 }
 0x15c   :  { %v1040_v63 = vpop.permute.xlu0 %312 }
 0x15f   :  { %v201_v0 = vpop.permute.xlu1 %200 }
 0x160   :  { %v197_v1 = vpop.permute.xlu0 %196 }
 0x163   :  { %v215_v2 = vpop.permute.xlu1 %214 }
 0x164   :  { %v213_v3 = vpop.permute.xlu0 %212 }
 0x165   :  { %v219_v24 = vsel %vm218_vm2, %v213_v3, %v215_v2 }
 0x167   :  { %v231_v4 = vpop.permute.xlu1 %230 }
 0x168   :  { %v229_v5 = vpop.permute.xlu0 %228 }
 0x169   :  { %v235_v28 = vsel %vm234_vm3, %v229_v5, %v231_v4 }
 0x16b   :  { %v247_v6 = vpop.permute.xlu1 %246 }
 0x16c   :  { %v245_v7 = vpop.permute.xlu0 %244 }
 0x16d   :  { %v251_v34 = vsel %vm250_vm4, %v245_v7, %v247_v6 }
 0x16f   :  { %v263_v8 = vpop.permute.xlu1 %262 }
 0x170   :  { %v261_v9 = vpop.permute.xlu0 %260 }
 0x171   :  { %v267_v42 = vsel %vm266_vm5, %v261_v9, %v263_v8 }
 0x173   :  { %v279_v10 = vpop.permute.xlu1 %278 }
 0x174   :  { %v277_v12 = vpop.permute.xlu0 %276 }
 0x175   :  { %v283_v49 = vsel %vm282_vm6, %v277_v12, %v279_v10 }
 0x177   :  { %v295_v14 = vpop.permute.xlu1 %294 }
 0x178   :  { %v293_v15 = vpop.permute.xlu0 %292 }
 0x179   :  { %v299_v56 = vsel %vm298_vm7, %v293_v15, %v295_v14 }
 0x17b   :  { %v311_v17 = vpop.permute.xlu1 %310 }
 0x17c   :  { %v199_v19 = vpop.permute.xlu0 %198  ;;  %v316_v57 = vsel %vm314_vm8, %v311_v17, %v1040_v63 }
 0x17d   :  { %v203_v20 = vsel %vm202_vm1, %v197_v1, %v199_v19  ;;  %v204_v29 = vsel %vm202_vm1, %v199_v19, %v201_v0 }
 0x17e   :  { %v207_v22 = vadd.f32 %v203_v20, %v932_v11  ;;  %v208_v11 = vadd.f32 %v204_v29, %v935_v13 }
 0x17f   :  { %v1043_v21 = vpop.permute.xlu1 %560 }
 0x180   :  { %v217_v23 = vpop.permute.xlu0 %216  ;;  %v223_v26 = vadd.f32 %v219_v24, %v207_v22 }
 0x181   :  { %v220_v33 = vsel %vm218_vm2, %v215_v2, %v217_v23 }
 0x182   :  { %v239_v31 = vadd.f32 %v235_v28, %v223_v26  ;;  %v224_v38 = vadd.f32 %v220_v33, %v208_v11 }
 0x183   :  { %v1047_v25 = vpop.permute.xlu1 %575 }
 0x184   :  { %v233_v27 = vpop.permute.xlu0 %232  ;;  %v255_v37 = vadd.f32 %v251_v34, %v239_v31 }
 0x185   :  { %v236_v35 = vsel %vm234_vm3, %v231_v4, %v233_v27 }
 0x186   :  { %v240_v41 = vadd.f32 %v236_v35, %v224_v38  ;;  %v271_v46 = vadd.f32 %v267_v42, %v255_v37 }
 0x187   :  { %v1051_v30 = vpop.permute.xlu1 %590 }
 0x188   :  { %v249_v32 = vpop.permute.xlu0 %248  ;;  %v287_v53 = vadd.f32 %v283_v49, %v271_v46 }
 0x189   :  { %v252_v40 = vsel %vm250_vm4, %v247_v6, %v249_v32 }
 0x18a   :  { %v256_v13 = vadd.f32 %v252_v40, %v240_v41  ;;  %v303_v60 = vadd.f32 %v299_v56, %v287_v53 }
 0x18b   :  { %v1057_v36 = vpop.permute.xlu1 %605 }
 0x18c   :  { %v265_v39 = vpop.permute.xlu0 %264 }
 0x18d   :  { %v268_v43 = vsel %vm266_vm5, %v263_v8, %v265_v39 }
 0x18e   :  { %v272_v48 = vadd.f32 %v268_v43, %v256_v13 }
 0x18f   :  { %v1062_v44 = vpop.permute.xlu1 %620 }
 0x190   :  { %v281_v45 = vpop.permute.xlu0 %280 }
 0x191   :  { %v284_v47 = vsel %vm282_vm6, %v279_v10, %v281_v45 }
 0x192   :  { %v288_v51 = vadd.f32 %v284_v47, %v272_v48 }
 0x193   :  { %v1066_v50 = vpop.permute.xlu1 %635 }
 0x194   :  { %v297_v52 = vpop.permute.xlu0 %296 }
 0x195   :  { %v300_v54 = vsel %vm298_vm7, %v295_v14, %v297_v52 }
 0x196   :  { %v304_v55 = vadd.f32 %v300_v54, %v288_v51 }
 0x197   :  { %v1072_v58 = vpop.permute.xlu1 %650 }
 0x198   :  { %v1074_v59 = vadd.f32 %v316_v57, %v304_v55  ;;  %v309_v61 = vpop.permute.xlu0 %308 }
 0x199   :  { %v315_v62 = vsel %vm314_vm8, %v309_v61, %v311_v17 }
 0x19a   :  { %v1078_v0 = vmul.f32 0.70710677, %v1074_v59  ;;  %v1080_v1 = vadd.f32 %v315_v62, %v303_v60 }
 0x19b   :  { %v1082_v2 = vpop.permute.xlu1 %665 }
 0x19c   :  { %v326_v3 = vand.u32 2147483647, %v1078_v0  ;;  %v1086_v4 = vmul.f32 0.70710677, %v1080_v1  ;;  %v563_v63 = vpop.permute.xlu0 %562  ;;  %vm366_vm9 = vcmp.lt.f32.partialorder %v1078_v0, 0.0 }
 0x19d   :  { %v566_v22 = vsel %vm202_vm1, %v1043_v21, %v563_v63 }
 0x19e   :  { %v328_v5 = vmul.f32 0.3275911, %v326_v3  ;;  %v325_v6 = vand.u32 2147483647, %v1086_v4  ;;  %v354_v19 = vsub.f32 0.0, %v326_v3  ;;  %v570_v29 = vadd.f32 %v566_v22, %v940_v16 }
 0x19f   :  { %v565_v7 = vpop.permute.xlu1 %564  ;;  %vm365_vm10 = vcmp.lt.f32.partialorder %v1086_v4, 0.0 }
 0x1a0   :  { %v330_v8 = vadd.f32 1.0, %v328_v5  ;;  %v327_v9 = vmul.f32 0.3275911, %v325_v6  ;;  %v578_v10 = vpop.permute.xlu0 %577  ;;  %v353_v23 = vsub.f32 0.0, %v325_v6  ;;  %v356_v28 = vmul.f32 %v354_v19, %v326_v3 }
 0x1a1   :  { %v581_v24 = vsel %vm218_vm2, %v1047_v25, %v578_v10  ;;  %v567_v31 = vsel %vm202_vm1, %v563_v63, %v565_v7 }
 0x1a2   :  { %808 = vrcp.f32 %v330_v8  ;;  %v329_v12 = vadd.f32 1.0, %v327_v9  ;;  %v585_v34 = vadd.f32 %v581_v24, %v570_v29  ;;  %v355_v38 = vmul.f32 %v353_v23, %v325_v6 }
 0x1a3   :  { %v580_v14 = vpop.permute.xlu1 %579  ;;  %v571_v25 = vadd.f32 %v567_v31, %v945_v18  ;;  %v359_v16 = vmul.f32 1.442695, %v356_v28 }
 0x1a4   :  { %v593_v15 = vpop.permute.xlu0 %592  ;;  %810 = vrcp.f32 %v329_v12  ;;  %v582_v35 = vsel %vm218_vm2, %v578_v10, %v580_v14  ;;  %v357_v51 = vmul.f32 1.442695, %v355_v38 }
 0x1a5   :  { %v596_v11 = vsel %vm234_vm3, %v1051_v30, %v593_v15  ;;  %v586_v30 = vadd.f32 %v582_v35, %v571_v25  ;;  %812 = vpow2.f32 %v359_v16 }
 0x1a6   :  { %v600_v42 = vadd.f32 %v596_v11, %v585_v34  ;;  %814 = vpow2.f32 %v357_v51  ;;  %v321_v51 = vmul.f32 0.5, %v1080_v1 }
 0x1a7   :  { %v595_v17 = vpop.permute.xlu1 %594 }
 0x1a8   :  { %v608_v20 = vpop.permute.xlu0 %607  ;;  %v597_v43 = vsel %vm234_vm3, %v593_v15, %v595_v17 }
 0x1a9   :  { %v611_v39 = vsel %vm250_vm4, %v1057_v36, %v608_v20  ;;  %v601_v52 = vadd.f32 %v597_v43, %v586_v30 }
 0x1aa   :  { %v615_v48 = vadd.f32 %v611_v39, %v600_v42  ;;  %v381_v39 = vlaneseq }
 0x1ab   :  { %v610_v26 = vpop.permute.xlu1 %609 }
 0x1ac   :  { %v809_v27 = vpop.eup %808  ;;  %v623_v32 = vpop.permute.xlu0 %622  ;;  %v612_v49 = vsel %vm250_vm4, %v608_v20, %v610_v26  ;;  %vm1131_vm11 = vcmp.lt.s32.totalorder %v381_v39, 256 }
 0x1ad   :  { %v336_v33 = vmul.f32 1.0614054, %v809_v27  ;;  %v626_v46 = vsel %vm266_vm5, %v1062_v44, %v623_v32  ;;  %v616_v61 = vadd.f32 %v612_v49, %v601_v52 }
 0x1ae   :  { %v811_v21 = vpop.eup %810  ;;  %v630_v55 = vadd.f32 %v626_v46, %v615_v48  ;;  %v382_v46 = vshrl.u32 %v381_v39, 7 }
 0x1af   :  { %v338_v37 = vadd.f32 -1.4531521, %v336_v33  ;;  %v625_v40 = vpop.permute.xlu1 %624  ;;  %v335_v41 = vmul.f32 1.0614054, %v811_v21  ;;  %v813_v31 = vpop.eup %812 }
 0x1b0   :  { %v638_v13 = vpop.permute.xlu0 %637  ;;  %v627_v56 = vsel %vm266_vm5, %v623_v32, %v625_v40 }
 0x1b1   :  { %v340_v45 = vmul.f32 %v809_v27, %v338_v37  ;;  %v337_v47 = vadd.f32 -1.4531521, %v335_v41  ;;  %v641_v36 = vsel %vm282_vm6, %v1066_v50, %v638_v13  ;;  %v631_v6 = vadd.f32 %v627_v56, %v616_v61  ;;  %v815_v37 = vpop.eup %814 }
 0x1b2   :  { %v645_v3 = vadd.f32 %v641_v36, %v630_v55  ;;  %v884_v41 = vmov 1966171168  }
 0x1b3   :  { %v342_v18 = vadd.f32 1.4214138, %v340_v45  ;;  %v640_v53 = vpop.permute.xlu1 %639  ;;  %v339_v54 = vmul.f32 %v811_v21, %v337_v47  ;;  %v379_v42 = vunpack.c.l.s4 %v884_v41 }
 0x1b4   :  { %v653_v57 = vpop.permute.xlu0 %652  ;;  %v642_v63 = vsel %vm282_vm6, %v638_v13, %v640_v53 }
 0x1b5   :  { %v344_v60 = vmul.f32 %v809_v27, %v342_v18  ;;  %v656_v44 = vsel %vm298_vm7, %v1072_v58, %v653_v57  ;;  %v341_v62 = vadd.f32 1.4214138, %v339_v54  ;;  %v646_v14 = vadd.f32 %v642_v63, %v631_v6 }
 0x1b6   :  { %v660_v8 = vadd.f32 %v656_v44, %v645_v3  ;;  %v380_v48 = vunpack.c.0.s8 %v379_v42  ;;  %v322_v18 = vmul.f32 0.5, %v1074_v59 }
 0x1b7   :  { %v346_v5 = vadd.f32 -0.28449672, %v344_v60  ;;  %v655_v50 = vpop.permute.xlu1 %654  ;;  %v343_v7 = vmul.f32 %v811_v21, %v341_v62 }
 0x1b8   :  { %v657_v9 = vsel %vm298_vm7, %v653_v57, %v655_v50  ;;  %v668_v10 = vpop.permute.xlu0 %667  ;;  %v383_v0 = vsub.s32 %v380_v48, %v382_v46 }
 0x1b9   :  { %v348_v12 = vmul.f32 %v809_v27, %v346_v5  ;;  %v671_v15 = vsel %vm314_vm8, %v1082_v2, %v668_v10  ;;  %v345_v17 = vadd.f32 -0.28449672, %v343_v7  ;;  %v661_v20 = vadd.f32 %v657_v9, %v646_v14 }
 0x1ba   :  { %v1114_v58 = vadd.f32 %v671_v15, %v660_v8 }
 0x1bb   :  { %v350_v19 = vadd.f32 0.2548296, %v348_v12  ;;  %v670_v22 = vpop.permute.xlu1 %669  ;;  %v347_v23 = vmul.f32 %v811_v21, %v345_v17 }
 0x1bc   :  { %v1117_v24 = vmul.f32 0.70710677, %v1114_v58  ;;  %v672_v26 = vsel %vm314_vm8, %v668_v10, %v670_v22 }
 0x1bd   :  { %v352_v28 = vmul.f32 %v809_v27, %v350_v19  ;;  %v1120_v29 = vadd.f32 %v672_v26, %v661_v20  ;;  %v349_v32 = vadd.f32 0.2548296, %v347_v23 }
 0x1be   :  { %v681_v33 = vand.u32 2147483647, %v1117_v24  ;;  %vm721_vm12 = vcmp.lt.f32.partialorder %v1117_v24, 0.0 }
 0x1bf   :  { %v362_v2 = vmul.f32 %v813_v31, %v352_v28  ;;  %v1124_v11 = vmul.f32 0.70710677, %v1120_v29  ;;  %v351_v34 = vmul.f32 %v811_v21, %v349_v32 }
 0x1c0   :  { %v683_v35 = vmul.f32 0.3275911, %v681_v33  ;;  %v709_v36 = vsub.f32 0.0, %v681_v33 }
 0x1c1   :  { %v364_v38 = vsub.f32 1.0, %v362_v2  ;;  %v682_v25 = vand.u32 2147483647, %v1124_v11  ;;  %v361_v40 = vmul.f32 %v815_v37, %v351_v34  ;;  %vm722_vm13 = vcmp.lt.f32.partialorder %v1124_v11, 0.0 }
 0x1c2   :  { %v685_v16 = vadd.f32 1.0, %v683_v35  ;;  %v711_v60 = vmul.f32 %v709_v36, %v681_v33 }
 0x1c3   :  { %v368_v27 = vsub.f32 0.0, %v364_v38  ;;  %v684_v43 = vmul.f32 0.3275911, %v682_v25  ;;  %v363_v13 = vsub.f32 1.0, %v361_v40  ;;  %v710_v56 = vsub.f32 0.0, %v682_v25 }
 0x1c4   :  { %816 = vrcp.f32 %v685_v16  ;;  %v713_v1 = vmul.f32 1.442695, %v711_v60  ;;  %v677_v16 = vmul.f32 0.5, %v1114_v58 }
 0x1c5   :  { %v370_v45 = vsel %vm366_vm9, %v368_v27, %v364_v38  ;;  %v686_v30 = vadd.f32 1.0, %v684_v43  ;;  %v367_v21 = vsub.f32 0.0, %v363_v13  ;;  %v712_v63 = vmul.f32 %v710_v56, %v682_v25 }
 0x1c6   :  { %v372_v47 = vadd.f32 1.0, %v370_v45  ;;  %v678_v27 = vmul.f32 0.5, %v1120_v29 }
 0x1c7   :  { %818 = vrcp.f32 %v686_v30  ;;  %v369_v49 = vsel %vm365_vm10, %v367_v21, %v363_v13  ;;  %v715_v8 = vmul.f32 1.442695, %v712_v63 }
 0x1c8   :  { %v371_v52 = vadd.f32 1.0, %v369_v49  ;;  %v374_v53 = vmul.f32 %v372_v47, %v322_v18  ;;  %820 = vpow2.f32 %v713_v1 }
 0x1c9   :  { %822 = vpow2.f32 %v715_v8 }
 0x1ca   :  { %v373_v54 = vmul.f32 %v371_v52, %v321_v51 }
 0x1cc   :  { %v377_v55 = vcombine.low %v373_v54, %v374_v53 }
 0x1ce   :  { %v817_v57 = vpop.eup %816  ;;  %v384_v61 = vrot.slane %v377_v55, %v383_v0 }
 0x1cf   :  { %v691_v44 = vmul.f32 1.0614054, %v817_v57 }
 0x1d0   :  { %v391_v3 = vrot.slane %v384_v61, %v383_v0 }
 0x1d1   :  { %v819_v4 = vpop.eup %818  ;;  %v693_v59 = vadd.f32 -1.4531521, %v691_v44 }
 0x1d2   :  { %v692_v5 = vmul.f32 1.0614054, %v819_v4  ;;  %397 = vst.msk [vmem:[#allocation5] sm:$0x3] %vm1131_vm11, %v391_v3  ;;  %v821_v26 = vpop.eup %820 }
 0x1d3   :  { %v695_v6 = vmul.f32 %v817_v57, %v693_v59  ;;  %v823_v33 = vpop.eup %822 }
 0x1d4   :  { %v694_v50 = vadd.f32 -1.4531521, %v692_v5 }
 0x1d5   :  { %v697_v7 = vadd.f32 1.4214138, %v695_v6 }
 0x1d6   :  { %v696_v9 = vmul.f32 %v819_v4, %v694_v50 }
 0x1d7   :  { %v699_v10 = vmul.f32 %v817_v57, %v697_v7 }
 0x1d8   :  { %v698_v12 = vadd.f32 1.4214138, %v696_v9 }
 0x1d9   :  { %v701_v14 = vadd.f32 -0.28449672, %v699_v10 }
 0x1da   :  { %v700_v15 = vmul.f32 %v819_v4, %v698_v12 }
 0x1db   :  { %v703_v17 = vmul.f32 %v817_v57, %v701_v14 }
 0x1dc   :  { %v702_v19 = vadd.f32 -0.28449672, %v700_v15 }
 0x1dd   :  { %v705_v20 = vadd.f32 0.2548296, %v703_v17 }
 0x1de   :  { %v704_v22 = vmul.f32 %v819_v4, %v702_v19 }
 0x1df   :  { %v707_v23 = vmul.f32 %v817_v57, %v705_v20 }
 0x1e0   :  { %v706_v28 = vadd.f32 0.2548296, %v704_v22 }
 0x1e1   :  { %v717_v31 = vmul.f32 %v821_v26, %v707_v23 }
 0x1e2   :  { %v708_v32 = vmul.f32 %v819_v4, %v706_v28 }
 0x1e3   :  { %v719_v2 = vsub.f32 1.0, %v717_v31 }
 0x1e4   :  { %v718_v34 = vmul.f32 %v823_v33, %v708_v32 }
 0x1e5   :  { %v723_v35 = vsub.f32 0.0, %v719_v2 }
 0x1e6   :  { %v720_v37 = vsub.f32 1.0, %v718_v34 }
 0x1e7   :  { %v725_v38 = vsel %vm721_vm12, %v723_v35, %v719_v2 }
 0x1e8   :  { %v724_v25 = vsub.f32 0.0, %v720_v37  ;;  %v727_v39 = vadd.f32 1.0, %v725_v38 }
 0x1ea   :  { %v726_v40 = vsel %vm722_vm13, %v724_v25, %v720_v37  ;;  %v729_v42 = vmul.f32 %v727_v39, %v677_v16 }
 0x1eb   :  { %v728_v41 = vadd.f32 1.0, %v726_v40 }
 0x1ed   :  { %v730_v43 = vmul.f32 %v728_v41, %v678_v27 }
 0x1ef   :  { %v733_v13 = vcombine.low %v729_v42, %v730_v43 }
 0x1f1   :  { %v740_v45 = vrot.slane %v733_v13, %v383_v0 }
 0x1f3   :  { %v747_v30 = vrot.slane %v740_v45, %v383_v0 }
 0x1f5   :  { %750 = vst.msk [vmem:[#allocation5 + $0x2] sm:$0x3] %vm1131_vm11, %v747_v30 }
 0x1f6   :  { %857 = shalt.err (!%p854_p12)
}
 0x1f7   :  { %s858_s10 = scalar_lea.hbm %s1157_s2, 64 }
 0x1f8   :  { %p859_p13 = scmp.ne.s32.totalorder %s1157_s2, %s858_s10  ;;  %p862_p0 = scmp.lt.u32.totalorder %s858_s10, %s1157_s2 }
 0x1fa   :  { %p864_p1 = pnand %p862_p0, %p859_p13 }
 0x1fc   :  { %867 = shalt.err (!%p864_p1)
}
 0x1fd   :  { %s886_s15 = smov 32   ;;  %s887_s16 = smov 2  }
 0x1fe   :  { %762 = dma.vmem_to_hbm [thread:$0]  %s757_s6, 64, %s1157_s2, [#allocation4], %s886_s15, %s886_s15, %s887_s16  }
 0x1ff   :  { %870 = dma.done.wait [#allocation4], 64  }
 0x200   :  { %871 = vsyncadd [#allocation4], 4294967232 }
 0x201   :  { %766 = vsyncpa [#allocation3], 1 }
 0x202   :  { %767 = vsyncpa [#allocation4], 1 }

</bundles_post_ra>
